<compile_context>
chip_gen: v5e
topology: v5e:2x2
jax: 0.10.0
libtpu: 0.0.40
codegen_flags: <defaults>
</compile_context>

<pallas_src>
import math

import jax
import jax.numpy as jnp
from jax.experimental import pallas as pl
from jax.experimental.pallas import tpu as pltpu


_SUBLANE_PACK = {4: 8, 2: 16, 1: 32}          # f32 / bf16 / int8-fp8
_TARGET_BLOCK_BYTES = 2 * 1024 * 1024          # ~2 MiB per block (85%+ roofline)
_VMEM_LIMIT_BYTES = 32 * 1024 * 1024           # safe on v5e/v6e/v7x


# --------------------------------------------------------------------------- #
# Kernels
# --------------------------------------------------------------------------- #
def _drop_path_kernel(scale_ref, x_ref, o_ref):
    # scale_ref: (TB, 1) per-sample scale (0.0 or 1/keep_prob) in x.dtype
    # x_ref / o_ref: (TB, TF) lane-dense tile
    o_ref[...] = x_ref[...] * scale_ref[...]


def _drop_path_add_kernel(scale_ref, x_ref, res_ref, o_ref):
    # Fused residual add: out = residual + scale * x
    o_ref[...] = res_ref[...] + x_ref[...] * scale_ref[...]


# --------------------------------------------------------------------------- #
# Tiling helpers
# --------------------------------------------------------------------------- #
def _num_tensorcores():
    """Best-effort TensorCore count per device (2 for v7x / megacore parts)."""
    try:
        kind = jax.devices()[0].device_kind.lower()
    except Exception:  # CPU emulation, odd runtimes, ...
        return 1
    single_core = ("v5 lite", "v5e", "v6 lite", "v6e")
    if any(s in kind for s in single_core):
        return 1
    return 2  # v4 / v5p megacore, v7x dual-TC; harmless if over-estimated


def _plan_tiles(B, F, itemsize, num_cores):
    """Pick (tb, tf) that are BlockSpec-legal and ~_TARGET_BLOCK_BYTES each."""
    pack = _SUBLANE_PACK.get(itemsize, 8)

    # ---- lane (feature) axis: full row if it fits, else multiple of 128 ----
    if F * itemsize <= _TARGET_BLOCK_BYTES:
        tf = F                                   # full dim -> always legal
    else:
        tf = max(128, (_TARGET_BLOCK_BYTES // (itemsize * 128)) * 128)

    # ---- sublane (batch) axis: full dim, or a multiple of the pack factor --
    if B <= pack:
        tb = B                                   # full dim -> always legal
    else:
        rows = max(1, _TARGET_BLOCK_BYTES // (tf * itemsize))
        tb = max(pack, (rows // pack) * pack)
        tb = min(tb, (B // pack) * pack)

    # ---- give every TensorCore work (only on multi-core chips, only when
    #      the tensor is big enough that the extra grid steps are worth it) --
    min_steps = 2 * num_cores
    if num_cores > 1 and B * F * itemsize >= min_steps * 256 * 1024:
        while (pl.cdiv(B, tb) * pl.cdiv(F, tf) < min_steps
               and B > pack and tb > pack):
            tb = max(pack, ((tb // 2) // pack) * pack)
        if pl.cdiv(B, tb) * pl.cdiv(F, tf) < min_steps and tf == F and F > 256:
            tf = max(128, ((pl.cdiv(F, min_steps) + 127) // 128) * 128)

    return tb, tf


# --------------------------------------------------------------------------- #
# Wrappers
# --------------------------------------------------------------------------- #
def _sample_scale(key, B, keep_prob, dtype):
    # Matches torch: floor(keep_prob + U[0,1)) -> {0,1}, then / keep_prob.
    rnd = jax.random.uniform(key, (B, 1), dtype=jnp.float32)
    keep = jnp.floor(keep_prob + rnd)
    return (keep / keep_prob).astype(dtype)


def _drop_path_call(x, scale, residual=None):
    orig_shape = x.shape
    B = int(orig_shape[0])
    F = int(math.prod(orig_shape[1:])) if len(orig_shape) > 1 else 1
    x2 = x.reshape(B, F)

    itemsize = jnp.dtype(x.dtype).itemsize
    tb, tf = _plan_tiles(B, F, itemsize, _num_tensorcores())
    nb, nf = pl.cdiv(B, tb), pl.cdiv(F, tf)

    fused = residual is not None
    inputs = [scale, x2]
    in_specs = [
        pl.BlockSpec((tb, 1), lambda i, j: (i, 0)),    # per-sample scale
        pl.BlockSpec((tb, tf), lambda i, j: (i, j)),   # x tile (lane-dense)
    ]
    if fused:
        inputs.append(residual.reshape(B, F))
        in_specs.append(pl.BlockSpec((tb, tf), lambda i, j: (i, j)))

    kernel = _drop_path_add_kernel if fused else _drop_path_kernel
    n_io_arrays = 3 if fused else 2

    out = pl.pallas_call(
        kernel,
        out_shape=jax.ShapeDtypeStruct((B, F), x.dtype),
        grid=(nb, nf),
        in_specs=in_specs,
        out_specs=pl.BlockSpec((tb, tf), lambda i, j: (i, j)),
        compiler_params=pltpu.CompilerParams(
            dimension_semantics=("parallel", "parallel"),
            vmem_limit_bytes=_VMEM_LIMIT_BYTES,
        ),
        cost_estimate=pl.CostEstimate(
            flops=(2 if fused else 1) * B * F,
            transcendentals=0,
            bytes_accessed=(n_io_arrays + 1) * B * F * itemsize // 1
            if False else n_io_arrays * B * F * itemsize + B * itemsize + B * F * itemsize,
        ),
    )(*inputs)
    return out.reshape(orig_shape)


def drop_path(x, drop_prob, training, key):
    """Stochastic depth per sample. x: (B, ...) with batch leading.

    drop_prob / training must be static Python values (the identity early
    return is a trace-time decision, as in the PyTorch module).
    """
    if drop_prob is None or drop_prob == 0.0 or not training:
        return x
    keep_prob = 1.0 - drop_prob
    scale = _sample_scale(key, int(x.shape[0]), keep_prob, x.dtype)
    return _drop_path_call(x, scale)


def drop_path_add(x, residual, drop_prob, training, key):
    """Opt-in fused variant: residual + drop_path(x). Saves one HBM pass."""
    if drop_prob is None or drop_prob == 0.0 or not training:
        return residual + x
    keep_prob = 1.0 - drop_prob
    scale = _sample_scale(key, int(x.shape[0]), keep_prob, x.dtype)
    return _drop_path_call(x, scale, residual=residual)


class DropPath:
    """Drop paths (Stochastic Depth) per sample, Pallas-backed forward."""

    def __init__(self, drop_prob=None):
        self.drop_prob = drop_prob
        self.training = True

    def __call__(self, x, key):
        return drop_path(x, self.drop_prob, self.training, key)

    def extra_repr(self):
        return "p={}".format(self.drop_prob)


# --------------------------------------------------------------------------- #
# Demo / self-test
# --------------------------------------------------------------------------- #
if __name__ == "__main__":
    key = jax.random.PRNGKey(0)
    k_x, k_res, k_mask = jax.random.split(key, 3)

    B, N, D = 2, 8, 32
    x = jax.random.normal(k_x, (B, N, D), dtype=jnp.float32)
    residual = jax.random.normal(k_res, (B, N, D), dtype=jnp.float32)

    module = DropPath(drop_prob=0.1)
    y = jax.block_until_ready(module(x, k_mask))
    assert y.shape == x.shape and y.dtype == x.dtype

    # Pure-JAX reference with the same mask draw.
    keep_prob = 1.0 - module.drop_prob
    rnd = jax.random.uniform(k_mask, (B, 1), dtype=jnp.float32)
    keep = jnp.floor(keep_prob + rnd)
    scale_ref = (keep / keep_prob)[:, :, None]
    ref = x * scale_ref
    assert jnp.allclose(y, ref, atol=1e-6), "drop_path mismatch vs reference"

    # Fused residual variant.
    y_fused = jax.block_until_ready(
        drop_path_add(x, residual, module.drop_prob, True, k_mask))
    ref_fused = residual + x * scale_ref
    assert jnp.allclose(y_fused, ref_fused, atol=1e-6), "fused mismatch"

    # Eval mode / zero drop_prob -> identity (no kernel launch).
    module.training = False
    y_eval = jax.block_until_ready(module(x, k_mask))
    assert jnp.array_equal(y_eval, x)

    print("KERNEL_OK")
</pallas_src>

<mosaic_0001>
module attributes {stable_mosaic.version = 11 : i64} {
  func.func @_drop_path_kernel(%arg0: i32, %arg1: i32, %arg2: memref<2x1xf32, #tpu.memory_space<vmem>>, %arg3: memref<2x256xf32, #tpu.memory_space<vmem>>, %arg4: memref<2x256xf32, #tpu.memory_space<vmem>>) attributes {dimension_semantics = [#tpu.dimension_semantics<parallel>, #tpu.dimension_semantics<parallel>], iteration_bounds = array<i64: 1, 1>, scalar_prefetch = 0 : i64, scratch_operands = 0 : i64, tpu.core_type = #tpu.core_type<tc>, window_params = [{transform_indices = @transform_0, window_bounds = array<i64: 2, 1>}, {transform_indices = @transform_1, window_bounds = array<i64: 2, 256>}, {transform_indices = @transform_2, window_bounds = array<i64: 2, 256>}]} {
    %c0 = arith.constant 0 : index
    %c0_0 = arith.constant 0 : index
    %0 = vector.load %arg3[%c0, %c0_0] : memref<2x256xf32, #tpu.memory_space<vmem>>, vector<2x256xf32>
    %c0_1 = arith.constant 0 : index
    %c0_2 = arith.constant 0 : index
    %1 = vector.load %arg2[%c0_1, %c0_2] : memref<2x1xf32, #tpu.memory_space<vmem>>, vector<2x1xf32>
    %2 = vector.broadcast %1 : vector<2x1xf32> to vector<2x256xf32>
    %3 = arith.mulf %0, %2 : vector<2x256xf32>
    %c0_3 = arith.constant 0 : index
    %c0_4 = arith.constant 0 : index
    %4 = vector.load %arg4[%c0_3, %c0_4] : memref<2x256xf32, #tpu.memory_space<vmem>>, vector<2x256xf32>
    tpu.vector_store %arg4[%c0_3, %c0_4], %3 {strides = array<i32>} : memref<2x256xf32, #tpu.memory_space<vmem>>, vector<2x256xf32>,
    return
  }
  func.func @transform_0(%arg0: i32, %arg1: i32) -> (i32, i32) {
    %c0_i32 = arith.constant 0 : i32
    %c0_i32_0 = arith.constant 0 : i32
    return %arg0, %c0_i32 : i32, i32
  }
  func.func @transform_1(%arg0: i32, %arg1: i32) -> (i32, i32) {
    %c0_i32 = arith.constant 0 : i32
    return %arg0, %arg1 : i32, i32
  }
  func.func @transform_2(%arg0: i32, %arg1: i32) -> (i32, i32) {
    %c0_i32 = arith.constant 0 : i32
    return %arg0, %arg1 : i32, i32
  }
}

</mosaic_0001>

<bundles_post_ra>
// kernel: tpu_custom_call.1
= control target key start
LH: loop header
LB: loop body
LE: loop exit
PB: predicated region body
PF: predicated region fallthrough
CT: control target
= control target key end

     0   :  { %7 = vsyncpa [#allocation3], 0  ;;  %s141_s0 = inlined_call_operand.vmem [shape: f32[2,1], index: 0, kind: input, shape index: {}]   ;;  %s142_s1 = inlined_call_operand.hbm [shape: f32[2,256], index: 1, kind: input, shape index: {}]   ;;  %s143_s2 = inlined_call_operand.hbm [shape: f32[2,256], index: 2, kind: output, shape index: {}]  }
   0x1   :  { %8 = vsyncpa [#allocation4], 0  ;;  %s16_s11 = sshll.u32 %s142_s1, 4  ;;  %s113_s12 = smov [#allocation2]   ;;  %s17_s11 = int_to_ptr.hbm [resolvable:$true] %s16_s11 }
   0x2   :  { %s18_s13 = sshll.u32 %s113_s12, 4  ;;  %s19_s13 = int_to_ptr.vmem [resolvable:$true] %s18_s13 }
   0x3   :  { %21 = dma.hbm_to_vmem [thread:$0]  %s17_s11, 64, %s19_s13, [#allocation3]  }
   0x4   :  { %109 = dma.done.wait [#allocation3], 64  }
   0x5   :  { %110 = vsyncadd [#allocation3], 4294967232  ;;  %v114_v0 = vmov 0   ;;  %v27_v1 = vld [vmem:[%s141_s0] sm:$0x3]  ;;  %s116_s1 = smov [#allocation5]  }
   0x6   :  { %60 = vset.pattern.permute.xlu0 %v114_v0  ;;  %v115_v2 = vmov 269488144   ;;  %v26_v6 = vld [vmem:[#allocation2] sm:$0xf]  ;;  %s44_s16 = sshll.u32 %s116_s1, 4  ;;  %s46_s19 = sshll.u32 %s143_s2, 4  ;;  %s45_s16 = int_to_ptr.vmem [resolvable:$true] %s44_s16  ;;  %s47_s19 = int_to_ptr.hbm [resolvable:$true] %s46_s19 }
   0x7   :  { %30 = vperm.xlu0 %60, %v27_v1   ;;  %v33_v3 = vunpack.c.l.s4 %v115_v2 }
   0x9   :  { %v34_v4 = vunpack.c.0.s8 %v33_v3 }
  0x79   :  { %v31_v5 = vpop.permute.xlu0 %30 }
  0x7a   :  { %v35_v7 = vperm.slane %v31_v5, %v34_v4 }
  0x7c   :  { %v37_v8 = vmul.f32 %v35_v7, %v26_v6 }
  0x7e   :  { %38 = vst [vmem:[#allocation5] sm:$0xf] %v37_v8 }
  0x7f   :  { %49 = dma.vmem_to_hbm [thread:$0]  %s45_s16, 64, %s47_s19, [#allocation4]  }
  0x80   :  { %111 = dma.done.wait [#allocation4], 64  }
  0x81   :  { %112 = vsyncadd [#allocation4], 4294967232 }
  0x82   :  { %54 = vsyncpa [#allocation3], 1 }
  0x83   :  { %55 = vsyncpa [#allocation4], 1 }

</bundles_post_ra>
